<compile_context>
chip_gen: v5e
topology: v5e:2x2
jax: 0.10.0
libtpu: 0.0.40
codegen_flags: <defaults>
</compile_context>

<pallas_src>
import functools
import math

import jax
import jax.numpy as jnp
from jax.experimental import pallas as pl
from jax.experimental.pallas import tpu as pltpu


def _mlp_kernel(x_ref, w1_ref, b1_ref, w2_ref, b2_ref, w3_ref, b3_ref, o_ref):
    """relu(x@W1+b1) -> relu(.@W2+b2) -> .@W3+b3 (f32 accumulation, bf16 MXU feeds)."""
    x = x_ref[...].astype(jnp.bfloat16)
    h1 = jnp.dot(x, w1_ref[...], preferred_element_type=jnp.float32) + b1_ref[...]
    h1 = jnp.maximum(h1, 0.0).astype(jnp.bfloat16)
    h2 = jnp.dot(h1, w2_ref[...], preferred_element_type=jnp.float32) + b2_ref[...]
    h2 = jnp.maximum(h2, 0.0).astype(jnp.bfloat16)
    # Final layer: lane dim is padded to a multiple of 128 in the wrapper, so this
    # matmul and the store are full-width (no masked vst.msk partial stores).
    o_ref[...] = (
        jnp.dot(h2, w3_ref[...], preferred_element_type=jnp.float32) + b3_ref[...]
    )


def _round_up(x, m):
    return ((x + m - 1) // m) * m


@functools.partial(jax.jit, static_argnames=("block_b",))
def mlp_forward(x, w1, b1, w2, b2, w3, b3, *, block_b=256):
    """Forward pass of the `mlp` module. Weights are (in, out); biases are (1, out)."""
    B, D = x.shape
    C = w3.shape[1]

    # --- Lane-dense output: pad class dim to a multiple of 128 (zeros). ---
    Cp = _round_up(C, 128)
    if Cp != C:
        w3 = jnp.pad(w3, ((0, 0), (0, Cp - C)))
        b3 = jnp.pad(b3, ((0, 0), (0, Cp - C)))

    # --- bf16 weights (no-op if already bf16); biases stay f32 for the f32 acc. ---
    w1 = w1.astype(jnp.bfloat16)
    w2 = w2.astype(jnp.bfloat16)
    w3 = w3.astype(jnp.bfloat16)
    b1 = b1.astype(jnp.float32)
    b2 = b2.astype(jnp.float32)
    b3 = b3.astype(jnp.float32)
    x = x.astype(jnp.float32)

    # Batch tile: fill the MXU M-dim (256 on v6e/v7x) and amortize ~0.35us/step
    # grid overhead. When B < block_b the block equals the full batch dim, which
    # is always a legal block shape. For huge D on v7x (64 MiB VMEM), raise
    # vmem_limit_bytes or K-tile the weights; irrelevant at D<=1024.
    tm = min(block_b, B)
    grid = (pl.cdiv(B, tm),)

    # Weights/biases replicated across the batch grid (constant block index), so
    # they are fetched once and stay resident across batch tiles.
    # NOTE: pipeline_mode=pl.Buffered(1) on these constant specs would drop the
    # redundant second buffer (helps VMEM headroom for large D on v7x); left at
    # the default here for maximum lowering portability.
    rep = lambda shape: pl.BlockSpec(shape, lambda i: (0, 0))

    out = pl.pallas_call(
        _mlp_kernel,
        out_shape=jax.ShapeDtypeStruct((B, Cp), jnp.float32),
        grid_spec=pltpu.PrefetchScalarGridSpec(
            num_scalar_prefetch=0,
            grid=grid,
            in_specs=[
                pl.BlockSpec((tm, D), lambda i: (i, 0)),   # x: tiled over batch
                rep((D, D)),                                # W1 (bf16)
                rep((1, D)),                                # b1 (f32)
                rep((D, D)),                                # W2 (bf16)
                rep((1, D)),                                # b2 (f32)
                rep((D, Cp)),                               # W3 (bf16, lane-padded)
                rep((1, Cp)),                               # b3 (f32, lane-padded)
            ],
            out_specs=pl.BlockSpec((tm, Cp), lambda i: (i, 0)),
        ),
        compiler_params=pltpu.CompilerParams(
            # Batch axis is embarrassingly parallel -> v7x can shard the grid
            # across its 2 TensorCores when the grid has >= 2 steps.
            dimension_semantics=("parallel",),
        ),
    )(x, w1, b1, w2, b2, w3, b3)

    return out[:, :C]


def xavier_uniform(key, fan_in, fan_out, dtype=jnp.float32):
    """Matches torch.nn.init.xavier_uniform_ (gain=1); stored as (in, out)."""
    bound = math.sqrt(6.0 / (fan_in + fan_out))
    return jax.random.uniform(
        key, (fan_in, fan_out), minval=-bound, maxval=bound, dtype=dtype
    )


def init_mlp_params(key, input_sz=512, classes_num=10):
    k1, k2, k3 = jax.random.split(key, 3)
    w1 = xavier_uniform(k1, input_sz, input_sz)
    b1 = jnp.zeros((1, input_sz), jnp.float32)
    w2 = xavier_uniform(k2, input_sz, input_sz)
    b2 = jnp.zeros((1, input_sz), jnp.float32)
    w3 = xavier_uniform(k3, input_sz, classes_num)
    b3 = jnp.zeros((1, classes_num), jnp.float32)
    return w1, b1, w2, b2, w3, b3


if __name__ == "__main__":
    # Small shapes consistent with the module: batch=8, input_sz=128, classes=10.
    B, D, C = 8, 128, 10
    key = jax.random.PRNGKey(0)
    kx, kp = jax.random.split(key)

    x = jax.random.normal(kx, (B, D), dtype=jnp.float32)
    params = init_mlp_params(kp, input_sz=D, classes_num=C)

    out = mlp_forward(x, *params)
    out = jax.block_until_ready(out)

    # Reference in plain JAX using the same bf16-rounded weights the kernel sees
    # (f32 activations end-to-end); tolerance loosened for the bf16 MXU feeds.
    w1, b1, w2, b2, w3, b3 = params
    w1f = w1.astype(jnp.bfloat16).astype(jnp.float32)
    w2f = w2.astype(jnp.bfloat16).astype(jnp.float32)
    w3f = w3.astype(jnp.bfloat16).astype(jnp.float32)
    ref = jnp.maximum(x @ w1f + b1, 0.0)
    ref = jnp.maximum(ref @ w2f + b2, 0.0)
    ref = ref @ w3f + b3

    assert out.shape == (B, C)
    assert jnp.allclose(out, ref, atol=5e-2, rtol=5e-2), "mismatch vs reference"

    print("KERNEL_OK")
</pallas_src>

<mosaic_0001>
module attributes {stable_mosaic.version = 11 : i64} {
  func.func @_mlp_kernel(%arg0: i32, %arg1: memref<8x128xf32, #tpu.memory_space<vmem>>, %arg2: memref<128x128xbf16, #tpu.memory_space<vmem>>, %arg3: memref<1x128xf32, #tpu.memory_space<vmem>>, %arg4: memref<128x128xbf16, #tpu.memory_space<vmem>>, %arg5: memref<1x128xf32, #tpu.memory_space<vmem>>, %arg6: memref<128x128xbf16, #tpu.memory_space<vmem>>, %arg7: memref<1x128xf32, #tpu.memory_space<vmem>>, %arg8: memref<8x128xf32, #tpu.memory_space<vmem>>) attributes {dimension_semantics = [#tpu.dimension_semantics<parallel>], iteration_bounds = array<i64: 1>, scalar_prefetch = 0 : i64, scratch_operands = 0 : i64, tpu.core_type = #tpu.core_type<tc>, window_params = [{transform_indices = @transform_0, window_bounds = array<i64: 8, 128>}, {pipeline_mode = #tpu.pipeline_mode<synchronous>, transform_indices = @transform_1, window_bounds = array<i64: 128, 128>}, {pipeline_mode = #tpu.pipeline_mode<synchronous>, transform_indices = @transform_2, window_bounds = array<i64: 1, 128>}, {pipeline_mode = #tpu.pipeline_mode<synchronous>, transform_indices = @transform_3, window_bounds = array<i64: 128, 128>}, {pipeline_mode = #tpu.pipeline_mode<synchronous>, transform_indices = @transform_4, window_bounds = array<i64: 1, 128>}, {pipeline_mode = #tpu.pipeline_mode<synchronous>, transform_indices = @transform_5, window_bounds = array<i64: 128, 128>}, {pipeline_mode = #tpu.pipeline_mode<synchronous>, transform_indices = @transform_6, window_bounds = array<i64: 1, 128>}, {transform_indices = @transform_7, window_bounds = array<i64: 8, 128>}]} {
    %c0 = arith.constant 0 : index
    %c0_0 = arith.constant 0 : index
    %0 = vector.load %arg1[%c0, %c0_0] : memref<8x128xf32, #tpu.memory_space<vmem>>, vector<8x128xf32>
    %1 = arith.truncf %0 : vector<8x128xf32> to vector<8x128xbf16>
    %c0_1 = arith.constant 0 : index
    %c0_2 = arith.constant 0 : index
    %2 = vector.load %arg2[%c0_1, %c0_2] : memref<128x128xbf16, #tpu.memory_space<vmem>>, vector<128x128xbf16>
    %cst = arith.constant dense<0.000000e+00> : vector<8x128xf32>
    %3 = tpu.matmul %1, %2, %cst {dimension_numbers = #tpu.dot_dimension_numbers<[1], [0], [0], [1], [0, 0, 1, 1], [], []>} : vector<8x128xbf16>, vector<128x128xbf16>, vector<8x128xf32> -> vector<8x128xf32>
    %c0_3 = arith.constant 0 : index
    %c0_4 = arith.constant 0 : index
    %4 = vector.load %arg3[%c0_3, %c0_4] : memref<1x128xf32, #tpu.memory_space<vmem>>, vector<1x128xf32>
    %5 = vector.broadcast %4 : vector<1x128xf32> to vector<8x128xf32>
    %6 = arith.addf %3, %5 : vector<8x128xf32>
    %cst_5 = arith.constant 0.000000e+00 : f32
    %7 = vector.broadcast %cst_5 : f32 to vector<8x128xf32>
    %8 = arith.maximumf %6, %7 : vector<8x128xf32>
    %9 = arith.truncf %8 : vector<8x128xf32> to vector<8x128xbf16>
    %c0_6 = arith.constant 0 : index
    %c0_7 = arith.constant 0 : index
    %10 = vector.load %arg4[%c0_6, %c0_7] : memref<128x128xbf16, #tpu.memory_space<vmem>>, vector<128x128xbf16>
    %cst_8 = arith.constant dense<0.000000e+00> : vector<8x128xf32>
    %11 = tpu.matmul %9, %10, %cst_8 {dimension_numbers = #tpu.dot_dimension_numbers<[1], [0], [0], [1], [0, 0, 1, 1], [], []>} : vector<8x128xbf16>, vector<128x128xbf16>, vector<8x128xf32> -> vector<8x128xf32>
    %c0_9 = arith.constant 0 : index
    %c0_10 = arith.constant 0 : index
    %12 = vector.load %arg5[%c0_9, %c0_10] : memref<1x128xf32, #tpu.memory_space<vmem>>, vector<1x128xf32>
    %13 = vector.broadcast %12 : vector<1x128xf32> to vector<8x128xf32>
    %14 = arith.addf %11, %13 : vector<8x128xf32>
    %cst_11 = arith.constant 0.000000e+00 : f32
    %15 = vector.broadcast %cst_11 : f32 to vector<8x128xf32>
    %16 = arith.maximumf %14, %15 : vector<8x128xf32>
    %17 = arith.truncf %16 : vector<8x128xf32> to vector<8x128xbf16>
    %c0_12 = arith.constant 0 : index
    %c0_13 = arith.constant 0 : index
    %18 = vector.load %arg6[%c0_12, %c0_13] : memref<128x128xbf16, #tpu.memory_space<vmem>>, vector<128x128xbf16>
    %cst_14 = arith.constant dense<0.000000e+00> : vector<8x128xf32>
    %19 = tpu.matmul %17, %18, %cst_14 {dimension_numbers = #tpu.dot_dimension_numbers<[1], [0], [0], [1], [0, 0, 1, 1], [], []>} : vector<8x128xbf16>, vector<128x128xbf16>, vector<8x128xf32> -> vector<8x128xf32>
    %c0_15 = arith.constant 0 : index
    %c0_16 = arith.constant 0 : index
    %20 = vector.load %arg7[%c0_15, %c0_16] : memref<1x128xf32, #tpu.memory_space<vmem>>, vector<1x128xf32>
    %21 = vector.broadcast %20 : vector<1x128xf32> to vector<8x128xf32>
    %22 = arith.addf %19, %21 : vector<8x128xf32>
    %c0_17 = arith.constant 0 : index
    %c0_18 = arith.constant 0 : index
    %23 = vector.load %arg8[%c0_17, %c0_18] : memref<8x128xf32, #tpu.memory_space<vmem>>, vector<8x128xf32>
    tpu.vector_store %arg8[%c0_17, %c0_18], %22 {strides = array<i32>} : memref<8x128xf32, #tpu.memory_space<vmem>>, vector<8x128xf32>,
    return
  }
  func.func @transform_0(%arg0: i32) -> (i32, i32) {
    %c0_i32 = arith.constant 0 : i32
    %c0_i32_0 = arith.constant 0 : i32
    return %arg0, %c0_i32 : i32, i32
  }
  func.func @transform_1(%arg0: i32) -> (i32, i32) {
    %c0_i32 = arith.constant 0 : i32
    %c0_i32_0 = arith.constant 0 : i32
    %c0_i32_1 = arith.constant 0 : i32
    return %c0_i32, %c0_i32_0 : i32, i32
  }
  func.func @transform_2(%arg0: i32) -> (i32, i32) {
    %c0_i32 = arith.constant 0 : i32
    %c0_i32_0 = arith.constant 0 : i32
    %c0_i32_1 = arith.constant 0 : i32
    return %c0_i32, %c0_i32_0 : i32, i32
  }
  func.func @transform_3(%arg0: i32) -> (i32, i32) {
    %c0_i32 = arith.constant 0 : i32
    %c0_i32_0 = arith.constant 0 : i32
    %c0_i32_1 = arith.constant 0 : i32
    return %c0_i32, %c0_i32_0 : i32, i32
  }
  func.func @transform_4(%arg0: i32) -> (i32, i32) {
    %c0_i32 = arith.constant 0 : i32
    %c0_i32_0 = arith.constant 0 : i32
    %c0_i32_1 = arith.constant 0 : i32
    return %c0_i32, %c0_i32_0 : i32, i32
  }
  func.func @transform_5(%arg0: i32) -> (i32, i32) {
    %c0_i32 = arith.constant 0 : i32
    %c0_i32_0 = arith.constant 0 : i32
    %c0_i32_1 = arith.constant 0 : i32
    return %c0_i32, %c0_i32_0 : i32, i32
  }
  func.func @transform_6(%arg0: i32) -> (i32, i32) {
    %c0_i32 = arith.constant 0 : i32
    %c0_i32_0 = arith.constant 0 : i32
    %c0_i32_1 = arith.constant 0 : i32
    return %c0_i32, %c0_i32_0 : i32, i32
  }
  func.func @transform_7(%arg0: i32) -> (i32, i32) {
    %c0_i32 = arith.constant 0 : i32
    %c0_i32_0 = arith.constant 0 : i32
    return %arg0, %c0_i32 : i32, i32
  }
}

</mosaic_0001>

<bundles_post_ra>
// kernel: mlp_forward.1
= control target key start
LH: loop header
LB: loop body
LE: loop exit
PB: predicated region body
PF: predicated region fallthrough
CT: control target
= control target key end

     0   :  { %s571_s0 = inlined_call_operand.vmem [shape: f32[8,128], index: 0, kind: input, shape index: {}]   ;;  %s572_s1 = inlined_call_operand.vmem [shape: bf16[128,128], index: 1, kind: input, shape index: {}]   ;;  %s573_s2 = inlined_call_operand.vmem [shape: f32[1,128], index: 2, kind: input, shape index: {}]   ;;  %s574_s3 = inlined_call_operand.vmem [shape: bf16[128,128], index: 3, kind: input, shape index: {}]   ;;  %s575_s4 = inlined_call_operand.vmem [shape: f32[1,128], index: 4, kind: input, shape index: {}]   ;;  %s576_s5 = inlined_call_operand.vmem [shape: bf16[128,128], index: 5, kind: input, shape index: {}]   ;;  %s577_s6 = inlined_call_operand.vmem [shape: f32[1,128], index: 6, kind: input, shape index: {}]   ;;  %s578_s7 = inlined_call_operand.hbm [shape: f32[8,128], index: 7, kind: output, shape index: {}]  }
   0x1   :  { %v396_v0 = vld [vmem:[%s572_s1 + $0x38] sm:$0xff]  ;;  %v395_v1 = vld [vmem:[%s572_s1 + $0x30] sm:$0xff]  ;;  %v394_v4 = vld [vmem:[%s572_s1 + $0x28] sm:$0xff] }
   0x2   :  { %97 = vmatpush.bf16.msra.mxu0 %v396_v0  ;;  %v404_v2 = vld [vmem:[%s574_s3 + $0x38] sm:$0xff]  ;;  %v403_v3 = vld [vmem:[%s574_s3 + $0x30] sm:$0xff] }
   0x3   :  { %180 = vmatpush.bf16.msra.mxu1 %v404_v2 }
   0x6   :  { %98 = vmatpush.bf16.msra.mxu0 %v395_v1 }
   0x7   :  { %12 = vsyncpa [#allocation3], 0  ;;  %181 = vmatpush.bf16.msra.mxu1 %v403_v3  ;;  %v402_v5 = vld [vmem:[%s574_s3 + $0x28] sm:$0xff]  ;;  %v393_v6 = vld [vmem:[%s572_s1 + $0x20] sm:$0xff]  ;;  %s443_s30 = smov [#allocation2]  }
   0x8   :  { %v401_v7 = vld [vmem:[%s574_s3 + $0x20] sm:$0xff]  ;;  %v392_v8 = vld [vmem:[%s572_s1 + $0x18] sm:$0xff]  ;;  %v391_v10 = vld [vmem:[%s572_s1 + $0x10] sm:$0xff]  ;;  %s282_s8 = sshll.u32 %s443_s30, 4  ;;  %s283_s8 = int_to_ptr.vmem [resolvable:$true] %s282_s8 }
   0x9   :  { %v400_v9 = vld [vmem:[%s574_s3 + $0x18] sm:$0xff]  ;;  %v399_v11 = vld [vmem:[%s574_s3 + $0x10] sm:$0xff]  ;;  %v390_v12 = vld [vmem:[%s572_s1 + $0x8] sm:$0xff] }
   0xa   :  { %99 = vmatpush.bf16.msra.mxu0 %v394_v4  ;;  %v389_v13 = vld [vmem:[%s572_s1] sm:$0xff]  ;;  %v398_v16 = vld [vmem:[%s574_s3 + $0x8] sm:$0xff]  ;;  %v412_v18 = vld [vmem:[%s576_s5 + $0x38] sm:$0xff] }
   0xb   :  { %182 = vmatpush.bf16.msra.mxu1 %v402_v5  ;;  %v27_v14 = vld [vmem:[%s571_s0] sm:$0xff]  ;;  %263 = vmatpush.bf16.msra.mxu2 %v412_v18  ;;  %v411_v19 = vld [vmem:[%s576_s5 + $0x30] sm:$0xff]  ;;  %v410_v20 = vld [vmem:[%s576_s5 + $0x28] sm:$0xff] }
   0xc   :  { %v28_v15 = vpack.c.bf16 %v27_v14, %v27_v14  ;;  %v397_v17 = vld [vmem:[%s574_s3] sm:$0xff]  ;;  %v408_v22 = vld [vmem:[%s576_s5 + $0x18] sm:$0xff]  ;;  %v407_v23 = vld [vmem:[%s576_s5 + $0x10] sm:$0xff] }
   0xd   :  { %v409_v21 = vld [vmem:[%s576_s5 + $0x20] sm:$0xff]  ;;  %v406_v30 = vld [vmem:[%s576_s5 + $0x8] sm:$0xff] }
   0xe   :  { %100 = vmatpush.bf16.msra.mxu0 %v393_v6  ;;  %v414_v24 = vld [vmem:[%s573_s2] ss:$0 sm:$0xff] }
   0xf   :  { %183 = vmatpush.bf16.msra.mxu1 %v401_v7  ;;  %264 = vmatpush.bf16.msra.mxu2 %v411_v19  ;;  %v405_v31 = vld [vmem:[%s576_s5] sm:$0xff]  ;;  %s284_s5 = sshll.u32 %s578_s7, 4  ;;  %s285_s5 = int_to_ptr.hbm [resolvable:$true] %s284_s5 }
  0x10   :  { %v415_v32 = vld [vmem:[%s575_s4] ss:$0 sm:$0xff] }
  0x11   :  { %v416_v38 = vld [vmem:[%s577_s6] ss:$0 sm:$0xff] }
  0x12   :  { %101 = vmatpush.bf16.msra.mxu0 %v392_v8 }
  0x13   :  { %184 = vmatpush.bf16.msra.mxu1 %v400_v9  ;;  %265 = vmatpush.bf16.msra.mxu2 %v410_v20 }
  0x16   :  { %102 = vmatpush.bf16.msra.mxu0 %v391_v10 }
  0x17   :  { %185 = vmatpush.bf16.msra.mxu1 %v399_v11  ;;  %266 = vmatpush.bf16.msra.mxu2 %v409_v21 }
  0x1a   :  { %103 = vmatpush.bf16.msra.mxu0 %v390_v12 }
  0x1b   :  { %186 = vmatpush.bf16.msra.mxu1 %v398_v16  ;;  %267 = vmatpush.bf16.msra.mxu2 %v408_v22 }
  0x1e   :  { %104 = vmatpush.bf16.msra.mxu0 %v389_v13 }
  0x1f   :  { %187 = vmatpush.bf16.msra.mxu1 %v397_v17  ;;  %268 = vmatpush.bf16.msra.mxu2 %v407_v23 }
  0x21   :  { %105 = vmatmul.bf16.vlgmr.msra.gmra.mxu0 %v28_v15 }
  0x23   :  { %269 = vmatpush.bf16.msra.mxu2 %v406_v30 }
  0x27   :  { %270 = vmatpush.bf16.msra.mxu2 %v405_v31 }
  0x9e   :  { %v106_v25 = vpop.f32.mrf.mxu0 }
  0x9f   :  { %v107_v26 = vadd.f32 %v414_v24, %v106_v25 }
  0xa1   :  { %v110_v27 = vmax.f32 %v107_v26, 0.0 }
  0xa3   :  { %v111_v28 = vpack.c.bf16 %v110_v27, %v110_v27 }
  0xa5   :  { %188 = vmatmul.bf16.vlgmr.msra.gmra.mxu1 %v111_v28 }
  0xa6   :  { %v108_v29 = vpop.f32.mrf.mxu0 }
 0x122   :  { %v189_v33 = vpop.f32.mrf.mxu1 }
 0x123   :  { %v190_v34 = vadd.f32 %v415_v32, %v189_v33 }
 0x125   :  { %v193_v35 = vmax.f32 %v190_v34, 0.0 }
 0x127   :  { %v194_v36 = vpack.c.bf16 %v193_v35, %v193_v35 }
 0x129   :  { %271 = vmatmul.bf16.vlgmr.msra.gmra.mxu2 %v194_v36 }
 0x12a   :  { %v191_v37 = vpop.f32.mrf.mxu1 }
 0x1ac   :  { %v272_v39 = vpop.f32.mrf.mxu2 }
 0x1ad   :  { %v273_v40 = vadd.f32 %v416_v38, %v272_v39 }
 0x1af   :  { %276 = vst [vmem:[#allocation2] sm:$0xff] %v273_v40 }
 0x1b0   :  { %287 = dma.vmem_to_hbm [thread:$0]  %s283_s8, 128, %s285_s5, [#allocation3]  }
 0x1b4   :  { %v274_v41 = vpop.f32.mrf.mxu2 }
 0x1b5   :  { %441 = dma.done.wait [#allocation3], 128  }
 0x1b6   :  { %442 = vsyncadd [#allocation3], 4294967168 }
 0x1b7   :  { %292 = vsyncpa [#allocation3], 1 }

</bundles_post_ra>
